<compile_context>
chip_gen: v6e
topology: v6e:2x2x1
jax: 0.10.0
libtpu: 0.0.40
codegen_flags: <defaults>
</compile_context>

<pallas_src>
import functools
import math

import jax
import jax.numpy as jnp
from jax import lax
from jax.experimental import pallas as pl
from jax.experimental.pallas import tpu as pltpu


def _flash_sdp_kernel(q_ref, k_ref, v_ref, o_ref,
                      q_sc, m_sc, l_sc, acc_sc,
                      *, scale, tk, sk, mask_k, compute_dtype):
    # q_ref: (1, tq, D), k_ref: (1, tk, D), v_ref: (1, tk, Dv), o_ref: (1, tq, Dv)
    # scratch: q_sc (tq, D) compute_dtype, m_sc/l_sc (tq, 1) f32, acc_sc (tq, Dv) f32
    ki = pl.program_id(2)

    @pl.when(ki == 0)
    def _init():
        # Q is resident across the ki axis: fold 1/sqrt(dk) in (in f32) and
        # cast to the MXU compute dtype exactly once per (b, qi) tile.
        q_sc[...] = (q_ref[0].astype(jnp.float32) * scale).astype(q_sc.dtype)
        m_sc[...] = jnp.full(m_sc.shape, -jnp.inf, dtype=m_sc.dtype)
        l_sc[...] = jnp.zeros(l_sc.shape, dtype=l_sc.dtype)
        acc_sc[...] = jnp.zeros(acc_sc.shape, dtype=acc_sc.dtype)

    q = q_sc[...]                              # (tq, D), already scaled
    k = k_ref[0].astype(compute_dtype)         # (tk, D)
    v = v_ref[0].astype(compute_dtype)         # (tk, Dv)

    # scores = (Q/sqrt(dk)) @ K^T, contracting over D directly (no explicit
    # transpose -> no XLU pass), f32 accumulation on the MXU.
    s = lax.dot_general(
        q, k,
        dimension_numbers=(((1,), (1,)), ((), ())),
        preferred_element_type=jnp.float32,
    )  # (tq, tk) f32

    if mask_k:
        # Ragged tail of the key axis: invalid columns -> -inf before the
        # max/exp; invalid V rows -> 0 so padded garbage cannot pollute PV.
        col = ki * tk + lax.broadcasted_iota(jnp.int32, s.shape, 1)
        s = jnp.where(col < sk, s, -jnp.inf)
        rowv = ki * tk + lax.broadcasted_iota(jnp.int32, v.shape, 0)
        v = jnp.where(rowv < sk, v, jnp.zeros_like(v))

    # Online (flash) softmax update, all statistics in f32.
    m_prev = m_sc[...]                                          # (tq, 1)
    m_new = jnp.maximum(m_prev, jnp.max(s, axis=-1, keepdims=True))
    alpha = jnp.exp(m_prev - m_new)                             # (tq, 1)
    p = jnp.exp(s - m_new)                                      # (tq, tk)

    l_sc[...] = alpha * l_sc[...] + jnp.sum(p, axis=-1, keepdims=True)
    acc_sc[...] = alpha * acc_sc[...] + lax.dot_general(
        p.astype(compute_dtype), v,
        dimension_numbers=(((1,), (0,)), ((), ())),
        preferred_element_type=jnp.float32,
    )
    m_sc[...] = m_new

    @pl.when(ki == pl.num_programs(2) - 1)
    def _finalize():
        # Exact division (NOT approx reciprocal): runs once per output tile,
        # so accuracy is free here.
        o_ref[0] = (acc_sc[...] / l_sc[...]).astype(o_ref.dtype)


def _choose_tile(dim, preferred):
    """Tile size: full extent if it fits, otherwise the largest sublane-aligned
    (x8) tile <= preferred; ragged tails are handled by cdiv grid + masking."""
    if dim <= preferred:
        return dim
    return max(8, (preferred // 8) * 8)


def scaled_dot_product(Q, K, V, *, tq_pref=512, tk_pref=512, mxu_dtype=None):
    """Pallas TPU scaled dot-product attention.

    Q: (B, Sq, D), K: (B, Sk, D), V: (B, Sk, Dv)  ->  (B, Sq, Dv)
    Matches torch: softmax(Q @ K^T / sqrt(D), dim=-1) @ V

    mxu_dtype: optional MXU operand dtype (e.g. jnp.bfloat16 for max throughput
    on v5e/v6e/v7x).  Default None keeps the input dtype so f32 inputs match
    the reference to tight tolerances.  Accumulation is always f32.
    """
    B, Sq, D = Q.shape
    Bk, Sk, Dk = K.shape
    Bv, Skv, Dv = V.shape
    assert B == Bk == Bv and D == Dk and Sk == Skv

    tq = _choose_tile(Sq, tq_pref)
    tk = _choose_tile(Sk, tk_pref)
    n_q = pl.cdiv(Sq, tq)
    n_k = pl.cdiv(Sk, tk)
    mask_k = (Sk % tk) != 0

    compute_dtype = jnp.dtype(mxu_dtype) if mxu_dtype is not None else jnp.dtype(Q.dtype)
    scale = 1.0 / math.sqrt(float(D))

    kernel = functools.partial(
        _flash_sdp_kernel,
        scale=scale, tk=tk, sk=Sk, mask_k=mask_k, compute_dtype=compute_dtype)

    in_bytes = jnp.dtype(Q.dtype).itemsize
    cost = pl.CostEstimate(
        flops=2 * B * Sq * Sk * (D + Dv),
        transcendentals=B * Sq * Sk,
        # K/V are re-streamed once per Q tile.
        bytes_accessed=in_bytes * (B * Sq * D + n_q * B * Sk * (D + Dv) + B * Sq * Dv),
    )

    grid_spec = pltpu.PrefetchScalarGridSpec(
        num_scalar_prefetch=0,
        grid=(B, n_q, n_k),
        in_specs=[
            pl.BlockSpec((1, tq, D), lambda b, qi, ki: (b, qi, 0)),
            pl.BlockSpec((1, tk, D), lambda b, qi, ki: (b, ki, 0)),
            pl.BlockSpec((1, tk, Dv), lambda b, qi, ki: (b, ki, 0)),
        ],
        # Same output block across the ki axis -> resident accumulator output.
        out_specs=pl.BlockSpec((1, tq, Dv), lambda b, qi, ki: (b, qi, 0)),
        scratch_shapes=[
            pltpu.VMEM((tq, D), compute_dtype),  # scaled (and downcast) Q
            pltpu.VMEM((tq, 1), jnp.float32),    # running max m
            pltpu.VMEM((tq, 1), jnp.float32),    # running denom l
            pltpu.VMEM((tq, Dv), jnp.float32),   # running output acc
        ],
    )

    return pl.pallas_call(
        kernel,
        out_shape=jax.ShapeDtypeStruct((B, Sq, Dv), Q.dtype),
        grid_spec=grid_spec,
        compiler_params=pltpu.CompilerParams(
            dimension_semantics=("parallel", "parallel", "arbitrary"),
            # Fits comfortably: per-step tiles are <= a few MiB even at D=128;
            # 48 MiB leaves headroom under v7x's 64 MiB physical VMEM while
            # raising the small default scoped limit on v5e/v6e.
            vmem_limit_bytes=48 * 1024 * 1024,
        ),
        cost_estimate=cost,
    )(Q, K, V)


def _reference(Q, K, V):
    # pure-JAX reference mirroring the PyTorch forward exactly
    dk = jnp.float32(K.shape[-1])
    x = jnp.einsum("bqd,bkd->bqk", Q, K) / jnp.sqrt(dk)
    x = jax.nn.softmax(x, axis=-1)
    return jnp.einsum("bqk,bkv->bqv", x, V)


if __name__ == "__main__":
    key = jax.random.PRNGKey(0)
    kq, kk, kv = jax.random.split(key, 3)

    B, Sq, Sk, D, Dv = 2, 8, 8, 32, 32
    Q = jax.random.normal(kq, (B, Sq, D), dtype=jnp.float32)
    K = jax.random.normal(kk, (B, Sk, D), dtype=jnp.float32)
    V = jax.random.normal(kv, (B, Sk, Dv), dtype=jnp.float32)

    out = scaled_dot_product(Q, K, V)
    out = jax.block_until_ready(out)

    ref = _reference(Q, K, V)
    assert out.shape == (B, Sq, Dv)
    assert jnp.allclose(out, ref, atol=1e-5, rtol=1e-5), "mismatch vs reference"

    print("KERNEL_OK")
</pallas_src>

<mosaic_0001>
module attributes {stable_mosaic.version = 11 : i64} {
  func.func @_flash_sdp_kernel(%arg0: i32, %arg1: i32, %arg2: i32, %arg3: memref<1x8x32xf32, #tpu.memory_space<vmem>>, %arg4: memref<1x8x32xf32, #tpu.memory_space<vmem>>, %arg5: memref<1x8x32xf32, #tpu.memory_space<vmem>>, %arg6: memref<1x8x32xf32, #tpu.memory_space<vmem>>, %arg7: memref<8x32xf32, #tpu.memory_space<vmem>>, %arg8: memref<8x1xf32, #tpu.memory_space<vmem>>, %arg9: memref<8x1xf32, #tpu.memory_space<vmem>>, %arg10: memref<8x32xf32, #tpu.memory_space<vmem>>) attributes {dimension_semantics = [#tpu.dimension_semantics<parallel>, #tpu.dimension_semantics<parallel>, #tpu.dimension_semantics<arbitrary>], iteration_bounds = array<i64: 2, 1, 1>, scalar_prefetch = 0 : i64, scratch_operands = 4 : i64, tpu.core_type = #tpu.core_type<tc>, window_params = [{transform_indices = @transform_0, window_bounds = array<i64: 1, 8, 32>}, {transform_indices = @transform_1, window_bounds = array<i64: 1, 8, 32>}, {transform_indices = @transform_2, window_bounds = array<i64: 1, 8, 32>}, {transform_indices = @transform_3, window_bounds = array<i64: 1, 8, 32>}]} {
    %c0_i32 = arith.constant 0 : i32
    %0 = arith.cmpi eq, %arg2, %c0_i32 : i32
    %1 = arith.extui %0 : i1 to i32
    %c0_i32_0 = arith.constant 0 : i32
    %2 = arith.cmpi ne, %1, %c0_i32_0 : i32
    scf.if %2 {
      %c0_25 = arith.constant 0 : index
      %c0_26 = arith.constant 0 : index
      %c0_27 = arith.constant 0 : index
      %34 = vector.load %arg3[%c0_25, %c0_26, %c0_27] : memref<1x8x32xf32, #tpu.memory_space<vmem>>, vector<1x8x32xf32>
      %35 = vector.shape_cast %34 : vector<1x8x32xf32> to vector<8x32xf32>
      %cst_28 = arith.constant 0.176776692 : f32
      %36 = vector.broadcast %cst_28 : f32 to vector<8x32xf32>
      %37 = arith.mulf %35, %36 : vector<8x32xf32>
      %c0_29 = arith.constant 0 : index
      %c0_30 = arith.constant 0 : index
      %38 = vector.load %arg7[%c0_29, %c0_30] : memref<8x32xf32, #tpu.memory_space<vmem>>, vector<8x32xf32>
      tpu.vector_store %arg7[%c0_29, %c0_30], %37 {strides = array<i32>} : memref<8x32xf32, #tpu.memory_space<vmem>>, vector<8x32xf32>,
      %cst_31 = arith.constant 0xFF800000 : f32
      %39 = vector.broadcast %cst_31 : f32 to vector<8x1xf32>
      %c0_32 = arith.constant 0 : index
      %c0_33 = arith.constant 0 : index
      %40 = vector.load %arg8[%c0_32, %c0_33] : memref<8x1xf32, #tpu.memory_space<vmem>>, vector<8x1xf32>
      tpu.vector_store %arg8[%c0_32, %c0_33], %39 {strides = array<i32>} : memref<8x1xf32, #tpu.memory_space<vmem>>, vector<8x1xf32>,
      %cst_34 = arith.constant 0.000000e+00 : f32
      %41 = vector.broadcast %cst_34 : f32 to vector<8x1xf32>
      %c0_35 = arith.constant 0 : index
      %c0_36 = arith.constant 0 : index
      %42 = vector.load %arg9[%c0_35, %c0_36] : memref<8x1xf32, #tpu.memory_space<vmem>>, vector<8x1xf32>
      tpu.vector_store %arg9[%c0_35, %c0_36], %41 {strides = array<i32>} : memref<8x1xf32, #tpu.memory_space<vmem>>, vector<8x1xf32>,
      %cst_37 = arith.constant 0.000000e+00 : f32
      %43 = vector.broadcast %cst_37 : f32 to vector<8x32xf32>
      %c0_38 = arith.constant 0 : index
      %c0_39 = arith.constant 0 : index
      %44 = vector.load %arg10[%c0_38, %c0_39] : memref<8x32xf32, #tpu.memory_space<vmem>>, vector<8x32xf32>
      tpu.vector_store %arg10[%c0_38, %c0_39], %43 {strides = array<i32>} : memref<8x32xf32, #tpu.memory_space<vmem>>, vector<8x32xf32>,
    } else {
    }
    %c0 = arith.constant 0 : index
    %c0_1 = arith.constant 0 : index
    %3 = vector.load %arg7[%c0, %c0_1] : memref<8x32xf32, #tpu.memory_space<vmem>>, vector<8x32xf32>
    %c0_2 = arith.constant 0 : index
    %c0_3 = arith.constant 0 : index
    %c0_4 = arith.constant 0 : index
    %4 = vector.load %arg4[%c0_2, %c0_3, %c0_4] : memref<1x8x32xf32, #tpu.memory_space<vmem>>, vector<1x8x32xf32>
    %5 = vector.shape_cast %4 : vector<1x8x32xf32> to vector<8x32xf32>
    %c0_5 = arith.constant 0 : index
    %c0_6 = arith.constant 0 : index
    %c0_7 = arith.constant 0 : index
    %6 = vector.load %arg5[%c0_5, %c0_6, %c0_7] : memref<1x8x32xf32, #tpu.memory_space<vmem>>, vector<1x8x32xf32>
    %7 = vector.shape_cast %6 : vector<1x8x32xf32> to vector<8x32xf32>
    %cst = arith.constant dense<0.000000e+00> : vector<8x8xf32>
    %8 = tpu.matmul %3, %5, %cst {dimension_numbers = #tpu.dot_dimension_numbers<[1], [1], [0], [0], [0, 0, 1, 0], [], []>} : vector<8x32xf32>, vector<8x32xf32>, vector<8x8xf32> -> vector<8x8xf32>
    %c0_8 = arith.constant 0 : index
    %c0_9 = arith.constant 0 : index
    %9 = vector.load %arg8[%c0_8, %c0_9] : memref<8x1xf32, #tpu.memory_space<vmem>>, vector<8x1xf32>
    %cst_10 = arith.constant dense<0xFF800000> : vector<8xf32>
    %10 = vector.multi_reduction <maximumf>, %8, %cst_10 [1] : vector<8x8xf32> to vector<8xf32>
    %11 = vector.shape_cast %10 : vector<8xf32> to vector<8x1xf32>
    %12 = arith.maximumf %9, %11 : vector<8x1xf32>
    %13 = arith.subf %9, %12 : vector<8x1xf32>
    %14 = math.exp %13 : vector<8x1xf32>
    %15 = vector.broadcast %12 : vector<8x1xf32> to vector<8x8xf32>
    %16 = arith.subf %8, %15 : vector<8x8xf32>
    %17 = math.exp %16 : vector<8x8xf32>
    %c0_11 = arith.constant 0 : index
    %c0_12 = arith.constant 0 : index
    %18 = vector.load %arg9[%c0_11, %c0_12] : memref<8x1xf32, #tpu.memory_space<vmem>>, vector<8x1xf32>
    %19 = arith.mulf %14, %18 : vector<8x1xf32>
    %cst_13 = arith.constant dense<0.000000e+00> : vector<8xf32>
    %20 = vector.multi_reduction <add>, %17, %cst_13 [1] : vector<8x8xf32> to vector<8xf32>
    %21 = vector.shape_cast %20 : vector<8xf32> to vector<8x1xf32>
    %22 = arith.addf %19, %21 : vector<8x1xf32>
    %c0_14 = arith.constant 0 : index
    %c0_15 = arith.constant 0 : index
    %23 = vector.load %arg9[%c0_14, %c0_15] : memref<8x1xf32, #tpu.memory_space<vmem>>, vector<8x1xf32>
    tpu.vector_store %arg9[%c0_14, %c0_15], %22 {strides = array<i32>} : memref<8x1xf32, #tpu.memory_space<vmem>>, vector<8x1xf32>,
    %c0_16 = arith.constant 0 : index
    %c0_17 = arith.constant 0 : index
    %24 = vector.load %arg10[%c0_16, %c0_17] : memref<8x32xf32, #tpu.memory_space<vmem>>, vector<8x32xf32>
    %25 = vector.broadcast %14 : vector<8x1xf32> to vector<8x32xf32>
    %26 = arith.mulf %25, %24 : vector<8x32xf32>
    %cst_18 = arith.constant dense<0.000000e+00> : vector<8x32xf32>
    %27 = tpu.matmul %17, %7, %cst_18 {dimension_numbers = #tpu.dot_dimension_numbers<[1], [0], [0], [1], [0, 0, 1, 1], [], []>} : vector<8x8xf32>, vector<8x32xf32>, vector<8x32xf32> -> vector<8x32xf32>
    %28 = arith.addf %26, %27 : vector<8x32xf32>
    %c0_19 = arith.constant 0 : index
    %c0_20 = arith.constant 0 : index
    %29 = vector.load %arg10[%c0_19, %c0_20] : memref<8x32xf32, #tpu.memory_space<vmem>>, vector<8x32xf32>
    tpu.vector_store %arg10[%c0_19, %c0_20], %28 {strides = array<i32>} : memref<8x32xf32, #tpu.memory_space<vmem>>, vector<8x32xf32>,
    %c0_21 = arith.constant 0 : index
    %c0_22 = arith.constant 0 : index
    %30 = vector.load %arg8[%c0_21, %c0_22] : memref<8x1xf32, #tpu.memory_space<vmem>>, vector<8x1xf32>
    tpu.vector_store %arg8[%c0_21, %c0_22], %12 {strides = array<i32>} : memref<8x1xf32, #tpu.memory_space<vmem>>, vector<8x1xf32>,
    %c0_i32_23 = arith.constant 0 : i32
    %31 = arith.cmpi eq, %arg2, %c0_i32_23 : i32
    %32 = arith.extui %31 : i1 to i32
    %c0_i32_24 = arith.constant 0 : i32
    %33 = arith.cmpi ne, %32, %c0_i32_24 : i32
    scf.if %33 {
      %c0_25 = arith.constant 0 : index
      %c0_26 = arith.constant 0 : index
      %34 = vector.load %arg10[%c0_25, %c0_26] : memref<8x32xf32, #tpu.memory_space<vmem>>, vector<8x32xf32>
      %c0_27 = arith.constant 0 : index
      %c0_28 = arith.constant 0 : index
      %35 = vector.load %arg9[%c0_27, %c0_28] : memref<8x1xf32, #tpu.memory_space<vmem>>, vector<8x1xf32>
      %36 = vector.broadcast %35 : vector<8x1xf32> to vector<8x32xf32>
      %37 = arith.divf %34, %36 : vector<8x32xf32>
      %c0_29 = arith.constant 0 : index
      %c0_30 = arith.constant 0 : index
      %c0_31 = arith.constant 0 : index
      %38 = vector.load %arg6[%c0_29, %c0_30, %c0_31] : memref<1x8x32xf32, #tpu.memory_space<vmem>>, vector<1x8x32xf32>
      %39 = vector.shape_cast %38 : vector<1x8x32xf32> to vector<8x32xf32>
      %40 = vector.shape_cast %37 : vector<8x32xf32> to vector<1x8x32xf32>
      tpu.vector_store %arg6[%c0_29, %c0_30, %c0_31], %40 {strides = array<i32>} : memref<1x8x32xf32, #tpu.memory_space<vmem>>, vector<1x8x32xf32>,
    } else {
    }
    return
  }
  func.func @transform_0(%arg0: i32, %arg1: i32, %arg2: i32) -> (i32, i32, i32) {
    %c0_i32 = arith.constant 0 : i32
    %c0_i32_0 = arith.constant 0 : i32
    return %arg0, %arg1, %c0_i32 : i32, i32, i32
  }
  func.func @transform_1(%arg0: i32, %arg1: i32, %arg2: i32) -> (i32, i32, i32) {
    %c0_i32 = arith.constant 0 : i32
    %c0_i32_0 = arith.constant 0 : i32
    return %arg0, %arg2, %c0_i32 : i32, i32, i32
  }
  func.func @transform_2(%arg0: i32, %arg1: i32, %arg2: i32) -> (i32, i32, i32) {
    %c0_i32 = arith.constant 0 : i32
    %c0_i32_0 = arith.constant 0 : i32
    return %arg0, %arg2, %c0_i32 : i32, i32, i32
  }
  func.func @transform_3(%arg0: i32, %arg1: i32, %arg2: i32) -> (i32, i32, i32) {
    %c0_i32 = arith.constant 0 : i32
    %c0_i32_0 = arith.constant 0 : i32
    return %arg0, %arg1, %c0_i32 : i32, i32, i32
  }
}

</mosaic_0001>

<bundles_post_ra>
// kernel: tpu_custom_call.1
= control target key start
LH: loop header
LB: loop body
LE: loop exit
PB: predicated region body
PF: predicated region fallthrough
CT: control target
= control target key end

     0   :  { %s1172_s0 = inlined_call_operand.hbm [shape: f32[2,8,32], index: 0, kind: input, shape index: {}]   ;;  %s1173_s1 = inlined_call_operand.hbm [shape: f32[2,8,32], index: 1, kind: input, shape index: {}]   ;;  %s1174_s2 = inlined_call_operand.hbm [shape: f32[2,8,32], index: 2, kind: input, shape index: {}]   ;;  %s1175_s3 = inlined_call_operand.hbm [shape: f32[2,8,32], index: 3, kind: output, shape index: {}]  }
   0x1   :  { %1179 = sst [smem:[#allocation18_spill]] %s1173_s1 }
   0x2   :  { %8 = vsyncpa [#allocation7], 0 }
   0x3   :  { %10 = vsyncpa [#allocation7 + $0x1], 0 }
   0x4   :  { %11 = vsyncpa [#allocation10], 0 }
   0x5   :  { %13 = vsyncpa [#allocation10 + $0x1], 0 }
   0x6   :  { %14 = vsyncpa [#allocation8], 0 }
   0x7   :  { %16 = vsyncpa [#allocation8 + $0x1], 0  ;;  %s961_s12 = smov 0   ;;  %s963_s13 = smov 0  }
   0x8   :  { %s965_s14 = smov 0   ;;  %s967_s15 = smov 0  }
   0x9   :  { %s969_s16 = smov 0   ;;  %s971_s17 = smov 0  }
   0xa LB: > { %1180 = sst [smem:[#allocation16_spill]] %s927_s16  ;;  %s992_s18 = sadd.s32 4294967295, %s931_s17   ;;  %s931_s17 = sphi %s971_s17, %s22_s17   ;;  %s927_s16 = sphi %s969_s16, %s1192_s16   ;;  %s923_s15 = sphi %s967_s15, %s1191_s15   ;;  %s919_s14 = sphi %s965_s14, %s1195_s14   ;;  %s915_s13 = sphi %s963_s13, %s1194_s13   ;;  %s911_s12 = sphi %s961_s12, %s1193_s12  }
   0xb   : > { %s644_s19 = sadd.s32 4294967294, %s931_s17   ;;  %s41_s20 = sadd.s32 1, %s927_s16 }
   0xc   : > { %s50_s21 = sadd.s32 1, %s919_s14  ;;  %p43_p0 = scmp.ge.s32.totalorder %s41_s20, 2 }
   0xd   : > { %p57_p1 = scmp.ne.s32.totalorder %s919_s14, %s915_s13  ;;  %p58_p2 = scmp.eq.s32.totalorder %s931_s17, 0 }
   0xe   : > { %p63_p3 = scmp.ne.s32.totalorder %s915_s13, %s911_s12  ;;  %s1197_s20 = smov (%p43_p0, %s41_s20), 0 }
   0xf   : > { %1181 = sst [smem:[#allocation17_spill]] %s1197_s20  ;;  %p1004_p4 = por %p58_p2, %p57_p1 }
  0x10   : > { %p64_p5 = scmp.eq.s32.totalorder %s992_s18, 0  ;;  %s45_s23 = ssub.s32 %s927_s16, %s1197_s20 }
  0x11   : > { %p145_p6 = scmp.eq.s32.totalorder %s992_s18, 1  ;;  %p48_p7 = scmp.eq.s32.totalorder %s45_s23, 0 }
  0x12   : > { %p1012_p8 = por %p64_p5, %p63_p3  ;;  %p151_p10 = scmp.eq.s32.totalorder %s644_s19, 1 }
  0x13   : > { %p1016_p9 = por %p145_p6, %p57_p1  ;;  %p701_p13 = scmp.lt.s32.totalorder %s931_s17, 2 }
  0x14   : > { %s1021_s26 = scalar_select %p48_p7, %s919_s14, %s50_s21  }
  0x15   : > { %p1023_p11 = por %p151_p10, %p63_p3  ;;  %s1176_s28 = sand.u32 1, %s919_s14  }
  0x16   : > { %s1032_s29 = sshll.u32 %s1176_s28, 3  ;;  %s1035_s30 = sshll.u32 %s927_s16, 7 }
  0x17   : > { %p1039_p0 = pnand %p701_p13, %p1004_p4  ;;  %s190_s5 = sand.u32 1, %s931_s17  }
  0x18   : > { %s1187_s1 = sld [smem:[#allocation18_spill]]  ;;  %s194_s9 = scalar_lea.vmem [#allocation9], %s1032_s29 }
  0x19   : > { %s202_s10 = sshll.u32 %s194_s9, 4  ;;  %p653_p1 = scmp.ge.s32.totalorder %s931_s17, 1  ;;  %s203_s10 = int_to_ptr.vmem [resolvable:$true] %s202_s10 }
  0x1a   : > { %p226_p2 = scmp.lt.s32.totalorder %s931_s17, 3  ;;  %s1051_s11 = scalar_lea.sflag [#allocation10], %s190_s5 }
  0x1b   : > { %p765_p3 = pneg %p1039_p0  ;;  %s776_s19 = scalar_lea.vmem %s203_s10, 128 }
  0x1c   : > { %p777_p4 = scmp.ne.s32.totalorder %s203_s10, %s776_s19  ;;  %s933_s21 = smov [#allocation9]  }
  0x1d   : > { %s781_s22 = sshll.u32 %s933_s21, 4  ;;  %s782_s22 = int_to_ptr.vmem [resolvable:$false] %s781_s22 }
  0x1e   : > { %s200_s8 = scalar_lea.hbm %s1187_s1, %s1035_s30  ;;  %p779_p5 = pnand %p777_p4, %p765_p3 }
  0x1f   : > { %s783_s23 = scalar_lea.vmem %s782_s22, 256  ;;  %p784_p7 = scmp.lt.s32.totalorder %s203_s10, %s782_s22 }
  0x20   : > { %p780_p6 = pneg %p779_p5  ;;  %p785_p10 = scmp.lt.s32.totalorder %s783_s23, %s776_s19 }
  0x22   : > { %p786_p13 = por %p785_p10, %p784_p7 }
  0x24   : > { %p787_p12 = pnand %p786_p13, %p780_p6 }
  0x26   : > { %790 = shalt.err (!%p787_p12)
}
  0x27   : > { %693 = dma.hbm_to_vmem [thread:$0]  (!%p1039_p0), %s200_s8, 128, %s203_s10, %s1051_s11  }
  0x28   : > { %p1065_p4 = pnand %p653_p1, %p226_p2  ;;  %s181_s9 = scalar_lea.hbm %s1172_s0, %s1035_s30 }
  0x29   : > { %s175_s19 = scalar_lea.vmem [#allocation6], %s1032_s29  ;;  %s219_s28 = scalar_lea.hbm %s1174_s2, %s1035_s30 }
  0x2a   : > { %s183_s21 = sshll.u32 %s175_s19, 4  ;;  %s1189_s1 = sand.u32 1, %s919_s14   ;;  %s184_s21 = int_to_ptr.vmem [resolvable:$true] %s183_s21 }
  0x2b   : > { %s172_s20 = scalar_lea.sflag [#allocation7], %s1189_s1  ;;  %s804_s8 = scalar_lea.vmem %s184_s21, 128 }
  0x2c   : > { %p805_p12 = scmp.ne.s32.totalorder %s184_s21, %s804_s8  ;;  %s934_s10 = smov [#allocation6]  }
  0x2d   : > { %s809_s16 = sshll.u32 %s934_s10, 4  ;;  %s810_s16 = int_to_ptr.vmem [resolvable:$false] %s809_s16 }
  0x2e   : > { %p807_p1 = pnand %p805_p12, %p765_p3  ;;  %s811_s6 = scalar_lea.vmem %s810_s16, 256 }
  0x2f   : > { %p812_p5 = scmp.lt.s32.totalorder %s184_s21, %s810_s16  ;;  %p813_p6 = scmp.lt.s32.totalorder %s811_s6, %s804_s8 }
  0x30   : > { %p808_p2 = pneg %p807_p1 }
  0x31   : > { %p814_p7 = por %p813_p6, %p812_p5 }
  0x33   : > { %p815_p10 = pnand %p814_p7, %p808_p2 }
  0x35   : > { %818 = shalt.err (!%p815_p10)
}
  0x36   : > { %690 = dma.hbm_to_vmem [thread:$0]  (!%p1039_p0), %s181_s9, 128, %s184_s21, %s172_s20  }
  0x37   : > { %s213_s1 = scalar_lea.vmem [#allocation11], %s1032_s29  ;;  %s935_s22 = smov [#allocation11]  }
  0x38   : > { %s221_s7 = sshll.u32 %s213_s1, 4  ;;  %s837_s16 = sshll.u32 %s935_s22, 4  ;;  %s222_s7 = int_to_ptr.vmem [resolvable:$true] %s221_s7  ;;  %s838_s16 = int_to_ptr.vmem [resolvable:$false] %s837_s16 }
  0x39   : > { %s832_s19 = scalar_lea.vmem %s222_s7, 128  ;;  %s839_s23 = scalar_lea.vmem %s838_s16, 256 }
  0x3a   : > { %p833_p13 = scmp.ne.s32.totalorder %s222_s7, %s832_s19  ;;  %p840_p2 = scmp.lt.s32.totalorder %s222_s7, %s838_s16 }
  0x3b   : > { %p841_p5 = scmp.lt.s32.totalorder %s839_s23, %s832_s19 }
  0x3c   : > { %p835_p12 = pnand %p833_p13, %p765_p3 }
  0x3d   : > { %p842_p6 = por %p841_p5, %p840_p2 }
  0x3e   : > { %p836_p1 = pneg %p835_p12 }
  0x40   : > { %p843_p7 = pnand %p842_p6, %p836_p1 }
  0x42   : > { %846 = shalt.err (!%p843_p7)
}
  0x43   : > { %696 = dma.hbm_to_vmem [thread:$0]  (!%p1039_p0), %s219_s28, 128, %s222_s7, %s1051_s11  }
  0x44   : > { %230 = sbr.rel (%p1065_p4) target bundleno = 868 (0x364), region = 32  ;;  %s1100_s9 = sand.u32 (!%p1065_p4), 1, %s915_s13  }
  0x45   : > { %s1103_s21 = sshll.u32 (!%p1065_p4), %s1100_s9, 3  ;;  %s233_s4 = scalar_lea.sflag (!%p1065_p4), [#allocation7], %s1100_s9 }
  0x46   : > { %s236_s8 = scalar_lea.vmem (!%p1065_p4), [#allocation6], %s1103_s21 }
  0x49   : > { %898 = dma.done.wait (%p1012_p8), %s233_s4, 128  }
  0x4a   : > { %900 = vsyncadd (%p1012_p8), %s233_s4, 4294967168  ;;  %s241_s28 = sand.u32 1, %s992_s18   ;;  %s245_s11 = scalar_lea.vmem [#allocation9], %s1103_s21 }
  0x4b   : > { %s242_s30 = scalar_lea.sflag [#allocation10], %s241_s28 }
  0x4c   : > { %902 = dma.done.wait (%p1012_p8), %s242_s30, 256  }
  0x4d   : > { %904 = vsyncadd (%p1012_p8), %s242_s30, 4294967040  ;;  %vm293_vm0 = vcmask 261120   ;;  %v936_v0 = vmov 0.0   ;;  %vm937_vm1 = vmmov 0   ;;  %v291_v1 = vld [vmem:[%s236_s8] sm:$0xff]  ;;  %v300_v2 = vld [vmem:[%s245_s11] sm:$0xff] }
  0x4e   : > { %669 = vmatprep.subr.mxu0 %v936_v0  ;;  %298 = vst.msk [vmem:[#allocation5] sm:$0xff] %vm293_vm0, %v936_v0  ;;  %671 = vmatprep.mubr.msk.f32.mxu0 %vm937_vm1, %v936_v0  ;;  %v292_v3 = vmul.f32 0.17677669, %v291_v1  ;;  %vm295_vm2 = vcmask 7168   ;;  %v938_v5 = vmov -inf   ;;  %vm380_vm3 = vcmask 64512  }
  0x4f   : > { %674 = vmatprep.subr.mxu1 %v936_v0  ;;  %676 = vmatprep.mubr.msk.f32.mxu1 %vm937_vm1, %v936_v0  ;;  %296 = vst.msk [vmem:[#allocation3] sm:$0xff] %vm295_vm2, %v938_v5  ;;  %297 = vst.msk [vmem:[#allocation4] sm:$0xff] %vm295_vm2, %v936_v0  ;;  %v939_v9 = vmov 0   ;;  %s254_s18 = scalar_lea.vmem [#allocation11], %s1103_s21  ;;  %s662_s24 = sshll.u32 %s923_s15, 7 }
  0x50   : > { %670 = vmatpush3.xpose.msk.msra.mxu0 %vm293_vm0, %v300_v2  ;;  %294 = vst.msk [vmem:[#allocation2] sm:$0xff] %vm293_vm0, %v292_v3  ;;  %755 = vset.pattern.permute.xlu0 %v939_v9  ;;  %v301_v14 = vld [vmem:[%s254_s18] sm:$0xff]  ;;  %s286_s5 = scalar_lea.vmem [#allocation12], %s1103_s21  ;;  %s513_s7 = scalar_lea.hbm %s1175_s3, %s662_s24 }
  0x51   : > { %756 = vset.pattern.permute.xlu1 %v939_v9  ;;  %675 = vmatpush3.msra.mxu1 %v301_v14  ;;  %s515_s10 = sshll.u32 %s286_s5, 4  ;;  %s501_s19 = scalar_lea.sflag [#allocation8], %s1100_s9  ;;  %s516_s10 = int_to_ptr.vmem [resolvable:$true] %s515_s10 }
  0x52   : > { %s847_s22 = scalar_lea.vmem %s516_s10, 128  ;;  %s940_s16 = smov [#allocation12]  }
  0x53   : > { %p848_p8 = scmp.ne.s32.totalorder %s516_s10, %s847_s22  ;;  %s851_s15 = sshll.u32 %s940_s16, 4  ;;  %s852_s15 = int_to_ptr.vmem [resolvable:$false] %s851_s15 }
  0x54   : > { %s853_s23 = scalar_lea.vmem %s852_s15, 256  ;;  %p854_p4 = scmp.lt.s32.totalorder %s516_s10, %s852_s15 }
  0x55   : > { %v404_v30 = vld [vmem:[#allocation5] sm:$0xff]  ;;  %p849_p0 = pnand %p848_p8, %p1016_p9  ;;  %p855_p10 = scmp.lt.s32.totalorder %s853_s23, %s847_s22 }
  0x56   : > { %v379_v10 = vld [vmem:[#allocation3] sm:$0xff]  ;;  %v396_v22 = vld [vmem:[#allocation4] sm:$0xff] }
  0x57   : > { %v299_v4 = vld [vmem:[#allocation2] sm:$0xff]  ;;  %p850_p3 = pneg %p849_p0  ;;  %p856_p13 = por %p855_p10, %p854_p4 }
  0x58   : > { %672 = vmatmul.mubr.msk.f32.vlgmr.msra.gmra.mxu0 %vm293_vm0, %v299_v4 }
  0x59   : > { %p857_p12 = pnand %p856_p13, %p850_p3 }
 0x118   : > { %v375_v6 = vpop.f32.mrf.mxu0 }
 0x119   : > { %v381_v7 = vsel %vm380_vm3, %v375_v6, -inf }
 0x11a   : > { %382 = vmax.xlane.f32.xlu0 %v381_v7  ;;  %v673_v8 = vpop.f32.mrf.mxu0 }
 0x1a3   : > { %v383_v11 = vpop.xlane.xlu0 %382 }
 0x1a4   : > { %v384_v12 = vmax.f32 %v379_v10, %v383_v11 }
 0x1a6   : > { %v385_v13 = vsub.f32 %v379_v10, %v384_v12  ;;  %486 = vst.msk [vmem:[#allocation3] sm:$0xff] %vm295_vm2, %v384_v12  ;;  %390 = vperm.xlu0 %755, %v384_v12  }
 0x1a8   : > { %v386_v20 = vmul.f32 1.442695, %v385_v13 }
 0x221   : > { %v391_v15 = vpop.permute.xlu0 %390 }
 0x222   : > { %v393_v16 = vsub.f32 %v375_v6, %v391_v15 }
 0x224   : > { %v394_v17 = vmul.f32 1.442695, %v393_v16 }
 0x226   : > { %757 = vpow2.f32 %v394_v17 }
 0x227   : > { %759 = vpow2.f32 %v386_v20 }
 0x233   : > { %v758_v18 = vpop.eup %757 }
 0x234   : > { %677 = vmatmul.mubr.msk.f32.vlgmr.msra.gmra.mxu1 %vm380_vm3, %v758_v18  ;;  %v398_v19 = vsel %vm380_vm3, %v758_v18, 0.0  ;;  %v760_v21 = vpop.eup %759 }
 0x235   : > { %399 = vadd.xlane.f32.xlu1 %v398_v19  ;;  %v397_v23 = vmul.f32 %v760_v21, %v396_v22 }
 0x2be   : > { %v400_v24 = vpop.xlane.xlu1 %399 }
 0x2bf   : > { %v401_v25 = vadd.f32 %v400_v24, %v397_v23 }
 0x2c1   : > { %403 = vst.msk [vmem:[#allocation4] sm:$0xff] %vm295_vm2, %v401_v25 }
 0x2c8   : > { %v491_v26 = vld [vmem:[#allocation4] sm:$0xff] }
 0x2c9   : > { %494 = vperm.xlu1 %756, %v491_v26  }
 0x2cd   : > { %407 = vperm.xlu1 %756, %v760_v21  }
 0x2f4   : > { %v480_v27 = vpop.f32.mrf.mxu1 }
 0x2f6   : > { %v678_v28 = vpop.f32.mrf.mxu1 }
 0x344   : > { %v495_v29 = vpop.permute.xlu1 %494 }
 0x345   : > { %761 = vrcp.f32 %v495_v29 }
 0x348   : > { %v408_v31 = vpop.permute.xlu1 %407 }
 0x349   : > { %v410_v32 = vmul.f32 %v408_v31, %v404_v30 }
 0x34b   : > { %v484_v33 = vadd.f32 %v480_v27, %v410_v32 }
 0x34d   : > { %485 = vst.msk [vmem:[#allocation5] sm:$0xff] %vm293_vm0, %v484_v33 }
 0x352   : > { %v762_v34 = vpop.eup %761 }
 0x354   : > { %v490_v35 = vld [vmem:[#allocation5] sm:$0xff] }
 0x355   : > { %v498_v36 = vmul.f32 %v762_v34, %v490_v35 }
 0x357   : > { %499 = vst.msk [vmem:[%s286_s5] sm:$0xff] %vm293_vm0, %v498_v36 }
 0x358   : > { %860 = shalt.err (!%p857_p12)
}
 0x359   : > { %s861_s20 = scalar_lea.hbm %s513_s7, 128  ;;  %s865_s21 = scalar_lea.hbm %s1175_s3, 256 }
 0x35a   : > { %p862_p1 = scmp.ne.s32.totalorder %s513_s7, %s861_s20  ;;  %p866_p6 = scmp.lt.s32.totalorder %s513_s7, %s1175_s3 }
 0x35b   : > { %p867_p7 = scmp.lt.s32.totalorder %s865_s21, %s861_s20 }
 0x35c   : > { %p863_p2 = pnand %p862_p1, %p1016_p9 }
 0x35d   : > { %p868_p8 = por %p867_p7, %p866_p6 }
 0x35e   : > { %p864_p5 = pneg %p863_p2 }
 0x360   : > { %p869_p0 = pnand %p868_p8, %p864_p5 }
 0x362   : > { %872 = shalt.err (!%p869_p0)
}
 0x363   : > { %685 = dma.vmem_to_hbm [thread:$0]  (%p1016_p9), %s516_s10, 128, %s513_s7, %s501_s19  }
 0x364 PF: > { %s527_s28 = sand.u32 1, %s911_s12   ;;  %p1190_p3 = scmp.ge.s32.totalorder %s931_s17, 2 }
 0x365   : > { %s528_s30 = scalar_lea.sflag [#allocation8], %s527_s28 }
 0x366   : > { %p698_p4 = pnand %p1190_p3, %p1023_p11 }
 0x368   : > { %p699_p10 = pneg %p698_p4 }
 0x36a   : > { %906 = dma.done.wait (%p699_p10), %s528_s30, 128  }
 0x36b   : > { %908 = vsyncadd (%p699_p10), %s528_s30, 4294967168  ;;  %s22_s17 = sadd.s32 1, %s931_s17   ;;  %s1191_s15 = sld [smem:[#allocation16_spill]] }
 0x36c   : > { %p19_p13 = scmp.ge.s32.totalorder %s22_s17, 4   ;;  %s1192_s16 = sld [smem:[#allocation17_spill]] }
 0x36d   : > { %s1193_s12 = smov %s915_s13  ;;  %s1194_s13 = smov %s919_s14 }
 0x36e   : > { %s1195_s14 = smov %s1021_s26  ;;  %21 = sbr.rel (!%p19_p13) target bundleno = 10 (0xa), region = 109 }
 0x373   :  { %533 = vsyncpa [#allocation7], 1 }
 0x374   :  { %535 = vsyncpa [#allocation7 + $0x1], 1 }
 0x375   :  { %536 = vsyncpa [#allocation10], 1 }
 0x376   :  { %538 = vsyncpa [#allocation10 + $0x1], 1 }
 0x377   :  { %539 = vsyncpa [#allocation8], 1 }
 0x378   :  { %541 = vsyncpa [#allocation8 + $0x1], 1 }

</bundles_post_ra>
